<compile_context>
chip_gen: v5e
topology: v5e:2x2
jax: 0.10.0
libtpu: 0.0.40
codegen_flags: <defaults>
</compile_context>

<pallas_src>
import jax
import jax.numpy as jnp
from jax.experimental import pallas as pl
from jax.experimental.pallas import tpu as pltpu

# ---- problem sizes (small, consistent with an image-classifier forward) ----
B = 2          # batch
C_IN = 4       # input channels
H = W = 16     # spatial
C_OUT = 32     # stem conv output channels ("hidden")
N_CLASS = 10   # classifier classes
KH = KW = 3    # conv kernel

HW = H * W                            # rows per image in the im2col matrix
BHW = B * HW                          # total im2col rows
K_RAW = KH * KW * C_IN                # 36
K_AUG = K_RAW + 1                     # +1 ones column carrying the conv bias
N_PAD = 128                           # pad class dim to a full lane width

TILE_HW = 128                         # im2col rows per grid step (per image)
T_PER_IMG = HW // TILE_HW             # row tiles per image (reduction axis)


def _classifier_kernel(patches_ref, wconv_ref, wfc_ref, bfc_ref, o_ref,
                       acc_ref):
    """One (batch b, row-tile t) grid step.

    patches_ref : (TILE_HW, K_AUG) bf16  im2col rows of image b, tile t
                                         (last column is 1.0 -> conv bias)
    wconv_ref   : (K_AUG, C_OUT)   bf16  conv weight, last row = conv bias
    wfc_ref     : (C_OUT, N_PAD)   bf16  FC weight, zero-padded classes
    bfc_ref     : (1, N_PAD)       f32   FC bias, zero-padded classes
    o_ref       : (1, 1, N_PAD)    f32   padded logits row for image b
    acc_ref     : (1, C_OUT)       f32   running pooled sum (VMEM scratch)
    """
    t = pl.program_id(1)

    @pl.when(t == 0)
    def _():
        acc_ref[...] = jnp.zeros_like(acc_ref)

    # conv (stride 1, pad 1) tile as ONE bf16 im2col matmul, f32 accumulation.
    # Bias is folded in via the ones column / bconv row.
    h = jnp.dot(patches_ref[...], wconv_ref[...],
                preferred_element_type=jnp.float32)       # (TILE_HW, C_OUT)
    h = jnp.maximum(h, 0.0)                               # ReLU

    # global-average-pool partial sum: XLU sublane reduction (free slot,
    # no MXU, no extra operand) accumulated across row tiles.
    acc_ref[...] += jnp.sum(h, axis=0, keepdims=True)     # (1, C_OUT)

    @pl.when(t == pl.num_programs(1) - 1)
    def _():
        pooled = acc_ref[...] * jnp.float32(1.0 / HW)     # (1, C_OUT) f32
        logits = jnp.dot(pooled.astype(jnp.bfloat16), wfc_ref[...],
                         preferred_element_type=jnp.float32) + bfc_ref[...]
        o_ref[...] = logits.reshape(o_ref.shape).astype(o_ref.dtype)


def mask_classifier_forward(x_nchw, params):
    """x_nchw: (B, C_IN, H, W) float32 -> (B, N_CLASS) float32 logits."""
    wconv, bconv, wfc, bfc = params

    # --- wrapper preprocessing: NCHW -> NHWC, zero-pad H/W by 1, im2col,
    #     append a ones column (conv bias), cast to bf16. No K zero-padding
    #     is materialized in HBM. ---
    x_nhwc = jnp.transpose(x_nchw, (0, 2, 3, 1))
    x_pad = jnp.pad(x_nhwc, ((0, 0), (1, 1), (1, 1), (0, 0)))
    patches = jnp.stack(
        [x_pad[:, kh:kh + H, kw:kw + W, :]
         for kh in range(KH) for kw in range(KW)],
        axis=3)                                            # (B, H, W, 9, C_IN)
    patches = patches.reshape(BHW, K_RAW)
    ones_col = jnp.ones((BHW, 1), patches.dtype)
    patches_aug = jnp.concatenate([patches, ones_col],
                                  axis=1).astype(jnp.bfloat16)   # (BHW, 37)

    # conv weight (C_OUT, C_IN, KH, KW) -> rows ordered (kh, kw, c_in) to
    # match the patch column ordering; append the bias row.
    wconv_mat = jnp.transpose(wconv, (2, 3, 1, 0)).reshape(K_RAW, C_OUT)
    wconv_aug = jnp.concatenate([wconv_mat, bconv.reshape(1, C_OUT)],
                                axis=0).astype(jnp.bfloat16)     # (37, C_OUT)

    # PyTorch Linear weight (N_CLASS, C_OUT) -> (C_OUT, N_PAD) zero-padded so
    # the output store is lane-dense; padded columns give zero logits.
    wfc_p = jnp.pad(jnp.transpose(wfc, (1, 0)),
                    ((0, 0), (0, N_PAD - N_CLASS))).astype(jnp.bfloat16)
    bfc_p = jnp.pad(bfc.reshape(1, N_CLASS),
                    ((0, 0), (0, N_PAD - N_CLASS)))              # (1, 128) f32

    out_pad = pl.pallas_call(
        _classifier_kernel,
        out_shape=jax.ShapeDtypeStruct((B, 1, N_PAD), jnp.float32),
        grid_spec=pltpu.PrefetchScalarGridSpec(
            num_scalar_prefetch=0,
            grid=(B, T_PER_IMG),   # (batch parallel, row-tile reduction)
            in_specs=[
                pl.BlockSpec((TILE_HW, K_AUG),
                             lambda b, t: (b * T_PER_IMG + t, 0)),
                pl.BlockSpec((K_AUG, C_OUT), lambda b, t: (0, 0)),
                pl.BlockSpec((C_OUT, N_PAD), lambda b, t: (0, 0)),
                pl.BlockSpec((1, N_PAD), lambda b, t: (0, 0)),
            ],
            out_specs=pl.BlockSpec((1, 1, N_PAD), lambda b, t: (b, 0, 0)),
            scratch_shapes=[pltpu.VMEM((1, C_OUT), jnp.float32)],
        ),
        compiler_params=pltpu.CompilerParams(
            dimension_semantics=("parallel", "arbitrary")),
    )(patches_aug, wconv_aug, wfc_p, bfc_p)

    return out_pad.reshape(B, N_PAD)[:, :N_CLASS]


def _reference_forward(x_nchw, params):
    """Pure-JAX f32 reference of the same forward for a sanity check."""
    wconv, bconv, wfc, bfc = params
    y = jax.lax.conv_general_dilated(
        x_nchw, wconv, window_strides=(1, 1), padding=((1, 1), (1, 1)),
        dimension_numbers=("NCHW", "OIHW", "NCHW"))
    y = y + bconv.reshape(1, C_OUT, 1, 1)
    y = jnp.maximum(y, 0.0)
    pooled = jnp.mean(y, axis=(2, 3))                 # (B, C_OUT)
    return pooled @ wfc.T + bfc


def _init_params(key):
    k1, k2, k3, k4 = jax.random.split(key, 4)
    wconv = 0.1 * jax.random.normal(k1, (C_OUT, C_IN, KH, KW), jnp.float32)
    bconv = 0.1 * jax.random.normal(k2, (C_OUT,), jnp.float32)
    wfc = 0.1 * jax.random.normal(k3, (N_CLASS, C_OUT), jnp.float32)
    bfc = 0.1 * jax.random.normal(k4, (N_CLASS,), jnp.float32)
    return wconv, bconv, wfc, bfc


if __name__ == "__main__":
    key = jax.random.PRNGKey(0)
    kx, kp = jax.random.split(key)
    x = jax.random.normal(kx, (B, C_IN, H, W), jnp.float32)
    params = _init_params(kp)

    logits = mask_classifier_forward(x, params)
    logits = jax.block_until_ready(logits)

    ref = _reference_forward(x, params)
    assert logits.shape == (B, N_CLASS)
    # bf16 operands with f32 accumulation: loosened tolerance.
    assert jnp.allclose(logits, ref, atol=1e-2, rtol=1e-2), (
        f"mismatch: max abs err {float(jnp.max(jnp.abs(logits - ref)))}")
    print("KERNEL_OK")
</pallas_src>

<mosaic_0001>
module attributes {stable_mosaic.version = 11 : i64} {
  func.func @_classifier_kernel(%arg0: i32, %arg1: i32, %arg2: memref<128x37xbf16, #tpu.memory_space<vmem>>, %arg3: memref<37x32xbf16, #tpu.memory_space<vmem>>, %arg4: memref<32x128xbf16, #tpu.memory_space<vmem>>, %arg5: memref<1x128xf32, #tpu.memory_space<vmem>>, %arg6: memref<1x1x128xf32, #tpu.memory_space<vmem>>, %arg7: memref<1x32xf32, #tpu.memory_space<vmem>>) attributes {dimension_semantics = [#tpu.dimension_semantics<parallel>, #tpu.dimension_semantics<arbitrary>], iteration_bounds = array<i64: 2, 2>, scalar_prefetch = 0 : i64, scratch_operands = 1 : i64, tpu.core_type = #tpu.core_type<tc>, window_params = [{transform_indices = @transform_0, window_bounds = array<i64: 128, 37>}, {pipeline_mode = #tpu.pipeline_mode<synchronous>, transform_indices = @transform_1, window_bounds = array<i64: 37, 32>}, {pipeline_mode = #tpu.pipeline_mode<synchronous>, transform_indices = @transform_2, window_bounds = array<i64: 32, 128>}, {pipeline_mode = #tpu.pipeline_mode<synchronous>, transform_indices = @transform_3, window_bounds = array<i64: 1, 128>}, {transform_indices = @transform_4, window_bounds = array<i64: 1, 1, 128>}]} {
    %c0_i32 = arith.constant 0 : i32
    %0 = arith.cmpi eq, %arg1, %c0_i32 : i32
    %1 = arith.extui %0 : i1 to i32
    %c0_i32_0 = arith.constant 0 : i32
    %2 = arith.cmpi ne, %1, %c0_i32_0 : i32
    scf.if %2 {
      %cst_11 = arith.constant 0.000000e+00 : f32
      %16 = vector.broadcast %cst_11 : f32 to vector<1x32xf32>
      %c0_12 = arith.constant 0 : index
      %c0_13 = arith.constant 0 : index
      %17 = vector.load %arg7[%c0_12, %c0_13] : memref<1x32xf32, #tpu.memory_space<vmem>>, vector<1x32xf32>
      tpu.vector_store %arg7[%c0_12, %c0_13], %16 {strides = array<i32>} : memref<1x32xf32, #tpu.memory_space<vmem>>, vector<1x32xf32>,
    } else {
    }
    %c0 = arith.constant 0 : index
    %c0_1 = arith.constant 0 : index
    %3 = vector.load %arg2[%c0, %c0_1] : memref<128x37xbf16, #tpu.memory_space<vmem>>, vector<128x37xbf16>
    %c0_2 = arith.constant 0 : index
    %c0_3 = arith.constant 0 : index
    %4 = vector.load %arg3[%c0_2, %c0_3] : memref<37x32xbf16, #tpu.memory_space<vmem>>, vector<37x32xbf16>
    %cst = arith.constant dense<0.000000e+00> : vector<128x32xf32>
    %5 = tpu.matmul %3, %4, %cst {dimension_numbers = #tpu.dot_dimension_numbers<[1], [0], [0], [1], [0, 0, 1, 1], [], []>} : vector<128x37xbf16>, vector<37x32xbf16>, vector<128x32xf32> -> vector<128x32xf32>
    %cst_4 = arith.constant 0.000000e+00 : f32
    %6 = vector.broadcast %cst_4 : f32 to vector<128x32xf32>
    %7 = arith.maximumf %5, %6 : vector<128x32xf32>
    %c0_5 = arith.constant 0 : index
    %c0_6 = arith.constant 0 : index
    %8 = vector.load %arg7[%c0_5, %c0_6] : memref<1x32xf32, #tpu.memory_space<vmem>>, vector<1x32xf32>
    %cst_7 = arith.constant dense<0.000000e+00> : vector<32xf32>
    %9 = vector.multi_reduction <add>, %7, %cst_7 [0] : vector<128x32xf32> to vector<32xf32>
    %10 = vector.shape_cast %9 : vector<32xf32> to vector<1x32xf32>
    %11 = arith.addf %8, %10 : vector<1x32xf32>
    %c0_8 = arith.constant 0 : index
    %c0_9 = arith.constant 0 : index
    %12 = vector.load %arg7[%c0_8, %c0_9] : memref<1x32xf32, #tpu.memory_space<vmem>>, vector<1x32xf32>
    tpu.vector_store %arg7[%c0_8, %c0_9], %11 {strides = array<i32>} : memref<1x32xf32, #tpu.memory_space<vmem>>, vector<1x32xf32>,
    %c1_i32 = arith.constant 1 : i32
    %13 = arith.cmpi eq, %arg1, %c1_i32 : i32
    %14 = arith.extui %13 : i1 to i32
    %c0_i32_10 = arith.constant 0 : i32
    %15 = arith.cmpi ne, %14, %c0_i32_10 : i32
    scf.if %15 {
      %c0_11 = arith.constant 0 : index
      %c0_12 = arith.constant 0 : index
      %16 = vector.load %arg7[%c0_11, %c0_12] : memref<1x32xf32, #tpu.memory_space<vmem>>, vector<1x32xf32>
      %cst_13 = arith.constant 3.906250e-03 : f32
      %17 = vector.broadcast %cst_13 : f32 to vector<1x32xf32>
      %18 = arith.mulf %16, %17 : vector<1x32xf32>
      %19 = arith.truncf %18 : vector<1x32xf32> to vector<1x32xbf16>
      %c0_14 = arith.constant 0 : index
      %c0_15 = arith.constant 0 : index
      %20 = vector.load %arg4[%c0_14, %c0_15] : memref<32x128xbf16, #tpu.memory_space<vmem>>, vector<32x128xbf16>
      %cst_16 = arith.constant dense<0.000000e+00> : vector<1x128xf32>
      %21 = tpu.matmul %19, %20, %cst_16 {dimension_numbers = #tpu.dot_dimension_numbers<[1], [0], [0], [1], [0, 0, 1, 1], [], []>} : vector<1x32xbf16>, vector<32x128xbf16>, vector<1x128xf32> -> vector<1x128xf32>
      %c0_17 = arith.constant 0 : index
      %c0_18 = arith.constant 0 : index
      %22 = vector.load %arg5[%c0_17, %c0_18] : memref<1x128xf32, #tpu.memory_space<vmem>>, vector<1x128xf32>
      %23 = arith.addf %21, %22 : vector<1x128xf32>
      %24 = vector.shape_cast %23 : vector<1x128xf32> to vector<1x1x128xf32>
      %c0_19 = arith.constant 0 : index
      %c0_20 = arith.constant 0 : index
      %c0_21 = arith.constant 0 : index
      %25 = vector.load %arg6[%c0_19, %c0_20, %c0_21] : memref<1x1x128xf32, #tpu.memory_space<vmem>>, vector<1x1x128xf32>
      tpu.vector_store %arg6[%c0_19, %c0_20, %c0_21], %24 {strides = array<i32>} : memref<1x1x128xf32, #tpu.memory_space<vmem>>, vector<1x1x128xf32>,
    } else {
    }
    return
  }
  func.func @transform_0(%arg0: i32, %arg1: i32) -> (i32, i32) {
    %c2_i32 = arith.constant 2 : i32
    %0 = arith.muli %arg0, %c2_i32 : i32
    %1 = arith.addi %0, %arg1 : i32
    %c0_i32 = arith.constant 0 : i32
    %c0_i32_0 = arith.constant 0 : i32
    return %1, %c0_i32 : i32, i32
  }
  func.func @transform_1(%arg0: i32, %arg1: i32) -> (i32, i32) {
    %c0_i32 = arith.constant 0 : i32
    %c0_i32_0 = arith.constant 0 : i32
    %c0_i32_1 = arith.constant 0 : i32
    return %c0_i32, %c0_i32_0 : i32, i32
  }
  func.func @transform_2(%arg0: i32, %arg1: i32) -> (i32, i32) {
    %c0_i32 = arith.constant 0 : i32
    %c0_i32_0 = arith.constant 0 : i32
    %c0_i32_1 = arith.constant 0 : i32
    return %c0_i32, %c0_i32_0 : i32, i32
  }
  func.func @transform_3(%arg0: i32, %arg1: i32) -> (i32, i32) {
    %c0_i32 = arith.constant 0 : i32
    %c0_i32_0 = arith.constant 0 : i32
    %c0_i32_1 = arith.constant 0 : i32
    return %c0_i32, %c0_i32_0 : i32, i32
  }
  func.func @transform_4(%arg0: i32, %arg1: i32) -> (i32, i32, i32) {
    %c0_i32 = arith.constant 0 : i32
    %c0_i32_0 = arith.constant 0 : i32
    %c0_i32_1 = arith.constant 0 : i32
    return %arg0, %c0_i32, %c0_i32_0 : i32, i32, i32
  }
}

</mosaic_0001>

<bundles_post_ra>
// kernel: tpu_custom_call.1
= control target key start
LH: loop header
LB: loop body
LE: loop exit
PB: predicated region body
PF: predicated region fallthrough
CT: control target
= control target key end

     0   :  { %9 = vsyncpa [#allocation4], 0  ;;  %s1033_s0 = inlined_call_operand.vmem [shape: bf16[512,37], index: 0, kind: input, shape index: {}]   ;;  %s1034_s1 = inlined_call_operand.vmem [shape: bf16[37,32], index: 1, kind: input, shape index: {}]   ;;  %s1035_s2 = inlined_call_operand.vmem [shape: bf16[32,128], index: 2, kind: input, shape index: {}]   ;;  %s1036_s3 = inlined_call_operand.vmem [shape: f32[1,128], index: 3, kind: input, shape index: {}]   ;;  %s1037_s4 = inlined_call_operand.hbm [shape: f32[2,1,128], index: 4, kind: output, shape index: {}]  }
   0x1   :  { %11 = vsyncpa [#allocation4 + $0x1], 0  ;;  %s853_s15 = smov 0   ;;  %s855_s16 = smov 0  }
   0x2   :  { %s857_s17 = smov 0   ;;  %s859_s18 = smov 0  }
   0x3   :  { %s861_s19 = smov 0   ;;  %s863_s20 = smov 0  }
   0x4   :  { %s865_s21 = smov 0   ;;  %s867_s22 = smov 0  }
   0x5 LB: > { %s565_s23 = sadd.s32 4294967295, %s824_s22   ;;  %s566_s24 = sadd.s32 4294967294, %s824_s22   ;;  %s824_s22 = sphi %s867_s22, %s17_s22   ;;  %s820_s21 = sphi %s865_s21, %s1046_s21   ;;  %s816_s20 = sphi %s863_s20, %s1045_s20   ;;  %s812_s19 = sphi %s861_s19, %s1044_s19   ;;  %s808_s18 = sphi %s859_s18, %s1043_s18   ;;  %s804_s17 = sphi %s857_s17, %s1042_s17   ;;  %s800_s16 = sphi %s855_s16, %s1041_s16   ;;  %s796_s15 = sphi %s853_s15, %s1040_s15  }
   0x6   : > { %s26_s25 = sadd.s32 1, %s816_s20  ;;  %s29_s26 = sadd.s32 1, %s820_s21 }
   0x7   : > { %p27_p0 = scmp.ge.s32.totalorder %s26_s25, 2  ;;  %p139_p1 = scmp.ne.s32.totalorder %s804_s17, %s800_s16 }
   0x8   : > { %p140_p2 = scmp.eq.s32.totalorder %s565_s23, 3  ;;  %p145_p4 = scmp.ne.s32.totalorder %s800_s16, %s796_s15 }
   0x9   : > { %s1048_s25 = smov (%p27_p0, %s26_s25), 0  ;;  %s1050_s26 = smov (!%p27_p0, %s29_s26), %s820_s21 }
   0xa   : > { %p902_p3 = por %p140_p2, %p139_p1  ;;  %p31_p5 = scmp.ge.s32.totalorder %s1050_s26, 2 }
   0xb   : > { %p146_p6 = scmp.eq.s32.totalorder %s566_s24, 3  ;;  %p571_p7 = scmp.ge.s32.totalorder %s824_s22, 1 }
   0xc   : > { %p186_p8 = scmp.lt.s32.totalorder %s824_s22, 5  ;;  %s1052_s26 = smov (%p31_p5, %s1050_s26), 0 }
   0xd   : > { %p912_p9 = por %p146_p6, %p145_p4  ;;  %s126_s29 = ssub.s32 %s820_s21, %s1052_s26 }
   0xe   : > { %p187_p10 = pnand %p571_p7, %p186_p8  ;;  %s129_s30 = sadd.s32 1, %s804_s17 }
   0xf   : > { %p127_p11 = scmp.eq.s32.totalorder %s126_s29, 0  ;;  %s211_s6 = sand.u32 (!%p187_p10), 1, %s800_s16  }
  0x10   : > { %190 = sbr.rel (%p187_p10) target bundleno = 399 (0x18f), region = 36  ;;  %s572_s7 = sshll.u32 (!%p187_p10), %s812_s19, 1 }
  0x11   : > { %s920_s5 = scalar_select %p127_p11, %s804_s17, %s129_s30  }
  0x12   : > { %s214_s8 = sadd.s32 (!%p187_p10), %s808_s18, %s572_s7  ;;  %s932_s14 = scalar_lea.vmem (!%p187_p10), [#allocation3], %s211_s6 }
  0x13   : > { %s573_s9 = sshll.u32 (!%p187_p10), %s214_s8, 4  ;;  %p575_p13 = scmp.ne.s32.totalorder (!%p187_p10), %s808_s18, 0 }
  0x14   : > { %p216_p12 = scmp.lt.s32.totalorder (!%p187_p10), %s573_s9, 63 }
  0x15   : > { %227 = sbr.rel (%p575_p13) target bundleno = 28 (0x1c), region = 40 }
  0x16   : > { %s1054_s9 = smov (!%p216_p12, %s573_s9), 63 }
  0x17   : > { %s574_s10 = sshll.u32 %s1054_s9, 2 }
  0x18   : > { %s928_s13 = scalar_lea.vmem %s1033_s0, %s574_s10 }
  0x1a   : > { %vm228_vm0 = vcmask 253952   ;;  %v826_v0 = vmov 0.0  }
  0x1b   : > { %229 = vst.msk [vmem:[#allocation2] sm:$0x1] %vm228_vm0, %v826_v0 }
  0x1c PF: > { %v250_v1 = vld [vmem:[%s1034_s1 + $0x10] sm:$0x7]  ;;  %vm331_vm1 = vcmask 1041408   ;;  %vm332_vm2 = vcmask 1042432   ;;  %v827_v3 = vmov 65535   ;;  %v645_v8 = vld [vmem:[%s1034_s1 + $0x8] sm:$0xff] }
  0x1d   : > { %v300_v2 = vunpack.c.l.b16 %v250_v1  ;;  %v333_v4 = vsel %vm331_vm1, 4294967295, %v827_v3  ;;  %v644_v9 = vld [vmem:[%s1034_s1] sm:$0xff]  ;;  %v638_v11 = vld [vmem:[%s928_s13 + $0x10] sm:$0xff]  ;;  %vm306_vm3 = vcmask 302080   ;;  %v637_v14 = vld [vmem:[%s928_s13 + $0x8] sm:$0xff]  ;;  %vm404_vm4 = vcmask 261120  }
  0x1e   : > { %v334_v5 = vsel %vm332_vm2, %v333_v4, 0  ;;  %v636_v10 = vld [vmem:[%s928_s13] sm:$0xff]  ;;  %v642_v13 = vld [vmem:[%s928_s13 + $0x30] sm:$0xff]  ;;  %v639_v15 = vld [vmem:[%s928_s13 + $0x18] sm:$0xff]  ;;  %vm443_vm5 = vcmask 253952   ;;  %p624_p0 = scmp.ne.s32.totalorder %s808_s18, 1 }
  0x1f   : > { %v303_v6 = vpack.c.b16 %v300_v2, %v300_v2  ;;  %v640_v12 = vld [vmem:[%s928_s13 + $0x20] sm:$0xff]  ;;  %v641_v16 = vld [vmem:[%s928_s13 + $0x28] sm:$0xff]  ;;  %v643_v17 = vld [vmem:[%s928_s13 + $0x38] sm:$0xff] }
  0x21   : > { %v336_v7 = vand.u32 %v334_v5, %v303_v6 }
  0x23   : > { %343 = vmatpush.bf16.msra.mxu0 %v336_v7  ;;  %648 = vmatpush.bf16.msra.mxu1 %v336_v7 }
  0x24   : > { %649 = vmatpush.bf16.msra.mxu2 %v336_v7  ;;  %650 = vmatpush.bf16.msra.mxu3 %v336_v7 }
  0x27   : > { %344 = vmatpush.bf16.msra.mxu0 %v645_v8  ;;  %651 = vmatpush.bf16.msra.mxu1 %v645_v8 }
  0x28   : > { %652 = vmatpush.bf16.msra.mxu2 %v645_v8  ;;  %653 = vmatpush.bf16.msra.mxu3 %v645_v8 }
  0x2b   : > { %345 = vmatpush.bf16.msra.mxu0 %v644_v9  ;;  %654 = vmatpush.bf16.msra.mxu1 %v644_v9 }
  0x2c   : > { %655 = vmatpush.bf16.msra.mxu2 %v644_v9  ;;  %656 = vmatpush.bf16.msra.mxu3 %v644_v9 }
  0x2e   : > { %616 = vmatmul.msk.bf16.vlgmr.msra.gmra.mxu0 %vm306_vm3, %v636_v10  ;;  %618 = vmatmul.msk.bf16.vlgmr.msra.gmra.mxu1 %vm306_vm3, %v638_v11 }
  0x2f   : > { %620 = vmatmul.msk.bf16.vlgmr.msra.gmra.mxu2 %vm306_vm3, %v640_v12  ;;  %622 = vmatmul.msk.bf16.vlgmr.msra.gmra.mxu3 %vm306_vm3, %v642_v13 }
  0x3e   : > { %617 = vmatmul.msk.bf16.gmra.mxu0 %vm306_vm3, %v637_v14  ;;  %619 = vmatmul.msk.bf16.gmra.mxu1 %vm306_vm3, %v639_v15 }
  0x3f   : > { %621 = vmatmul.msk.bf16.gmra.mxu2 %vm306_vm3, %v641_v16  ;;  %623 = vmatmul.msk.bf16.gmra.mxu3 %vm306_vm3, %v643_v17 }
  0xab   : > { %v347_v18 = vpop.f32.mrf.mxu0  ;;  %v357_v19 = vpop.f32.mrf.mxu1 }
  0xac   : > { %v387_v28 = vmax.f32 %v347_v18, 0.0  ;;  %v391_v36 = vmax.f32 %v357_v19, 0.0 }
  0xae   : > { %v405_v31 = vsel %vm404_vm4, %v387_v28, 0.0  ;;  %v412_v44 = vsel %vm404_vm4, %v391_v36, 0.0 }
  0xb2   : > { %v367_v20 = vpop.f32.mrf.mxu2  ;;  %v377_v23 = vpop.f32.mrf.mxu3 }
  0xb3   : > { %v349_v21 = vpop.f32.mrf.mxu0  ;;  %v359_v22 = vpop.f32.mrf.mxu1  ;;  %v395_v50 = vmax.f32 %v367_v20, 0.0  ;;  %v399_v0 = vmax.f32 %v377_v23, 0.0 }
  0xb4   : > { %v388_v26 = vmax.f32 %v349_v21, 0.0  ;;  %v392_v40 = vmax.f32 %v359_v22, 0.0  ;;  %v403_v22 = vld [vmem:[#allocation2] sm:$0x1] }
  0xb5   : > { %v420_v58 = vsel %vm404_vm4, %v395_v50, 0.0  ;;  %v428_v7 = vsel %vm404_vm4, %v399_v0, 0.0 }
  0xb6   : > { %v406_v30 = vsel %vm404_vm4, %v388_v26, 0.0  ;;  %v414_v47 = vsel %vm404_vm4, %v392_v40, 0.0 }
  0xb7   : > { %v407_v33 = vadd.f32 %v406_v30, %v405_v31 }
  0xba   : > { %v369_v25 = vpop.f32.mrf.mxu2  ;;  %v379_v35 = vpop.f32.mrf.mxu3 }
  0xbb   : > { %v352_v24 = vpop.f32.mrf.mxu0  ;;  %v362_v27 = vpop.f32.mrf.mxu1  ;;  %v396_v54 = vmax.f32 %v369_v25, 0.0  ;;  %v400_v3 = vmax.f32 %v379_v35, 0.0 }
  0xbc   : > { %v389_v29 = vmax.f32 %v352_v24, 0.0  ;;  %v393_v45 = vmax.f32 %v362_v27, 0.0 }
  0xbd   : > { %v422_v61 = vsel %vm404_vm4, %v396_v54, 0.0  ;;  %v430_v10 = vsel %vm404_vm4, %v400_v3, 0.0 }
  0xbe   : > { %v408_v32 = vsel %vm404_vm4, %v389_v29, 0.0  ;;  %v416_v51 = vsel %vm404_vm4, %v393_v45, 0.0 }
  0xbf   : > { %v409_v38 = vadd.f32 %v408_v32, %v407_v33 }
  0xc2   : > { %v372_v39 = vpop.f32.mrf.mxu2  ;;  %v382_v53 = vpop.f32.mrf.mxu3 }
  0xc3   : > { %v354_v34 = vpop.f32.mrf.mxu0  ;;  %v364_v43 = vpop.f32.mrf.mxu1  ;;  %v397_v59 = vmax.f32 %v372_v39, 0.0  ;;  %v401_v8 = vmax.f32 %v382_v53, 0.0 }
  0xc4   : > { %v390_v37 = vmax.f32 %v354_v34, 0.0  ;;  %v394_v48 = vmax.f32 %v364_v43, 0.0 }
  0xc5   : > { %v424_v1 = vsel %vm404_vm4, %v397_v59, 0.0  ;;  %v432_v13 = vsel %vm404_vm4, %v401_v8, 0.0 }
  0xc6   : > { %v410_v41 = vsel %vm404_vm4, %v390_v37, 0.0  ;;  %v418_v55 = vsel %vm404_vm4, %v394_v48, 0.0 }
  0xc7   : > { %v411_v42 = vadd.f32 %v410_v41, %v409_v38 }
  0xc9   : > { %v413_v46 = vadd.f32 %v412_v44, %v411_v42 }
  0xca   : > { %v374_v57 = vpop.f32.mrf.mxu2  ;;  %v384_v6 = vpop.f32.mrf.mxu3 }
  0xcb   : > { %v415_v49 = vadd.f32 %v414_v47, %v413_v46  ;;  %v398_v62 = vmax.f32 %v374_v57, 0.0  ;;  %v402_v11 = vmax.f32 %v384_v6, 0.0 }
  0xcd   : > { %v417_v52 = vadd.f32 %v416_v51, %v415_v49  ;;  %v426_v4 = vsel %vm404_vm4, %v398_v62, 0.0  ;;  %v434_v15 = vsel %vm404_vm4, %v402_v11, 0.0 }
  0xcf   : > { %v419_v56 = vadd.f32 %v418_v55, %v417_v52 }
  0xd1   : > { %v421_v60 = vadd.f32 %v420_v58, %v419_v56 }
  0xd3   : > { %v423_v63 = vadd.f32 %v422_v61, %v421_v60 }
  0xd5   : > { %v425_v2 = vadd.f32 %v424_v1, %v423_v63 }
  0xd7   : > { %v427_v5 = vadd.f32 %v426_v4, %v425_v2 }
  0xd9   : > { %v429_v9 = vadd.f32 %v428_v7, %v427_v5 }
  0xdb   : > { %v431_v12 = vadd.f32 %v430_v10, %v429_v9 }
  0xdd   : > { %v433_v14 = vadd.f32 %v432_v13, %v431_v12 }
  0xdf   : > { %v435_v16 = vadd.f32 %v434_v15, %v433_v14 }
  0xe1   : > { %v436_v17 = vrot.slane %v435_v16, 4 }
  0xe3   : > { %v437_v18 = vadd.f32 %v436_v17, %v435_v16 }
  0xe5   : > { %v438_v19 = vrot.slane %v437_v18, 2 }
  0xe7   : > { %v439_v20 = vadd.f32 %v438_v19, %v437_v18 }
  0xe9   : > { %v440_v21 = vrot.slane %v439_v20, 1 }
  0xeb   : > { %v441_v23 = vadd.f32 %v440_v21, %v439_v20  ;;  %448 = sbr.rel (%p624_p0) target bundleno = 385 (0x181), region = 44 }
  0xed   : > { %v442_v24 = vadd.f32 %v441_v23, %v403_v22 }
  0xef   : > { %444 = vst.msk [vmem:[#allocation2] sm:$0x1] %vm443_vm5, %v442_v24 }
  0xf0   : > { %v647_v25 = vld [vmem:[%s1035_s2 + $0x8] sm:$0xff]  ;;  %v646_v28 = vld [vmem:[%s1035_s2] sm:$0xff] }
  0xf1   : > { %478 = vmatpush.bf16.msra.mxu0 %v647_v25  ;;  %v456_v30 = vld [vmem:[%s1036_s3] sm:$0x1] }
  0xf5   : > { %479 = vmatpush.bf16.msra.mxu0 %v646_v28 }
  0xf6   : > { %v449_v26 = vld [vmem:[#allocation2] sm:$0x1] }
  0xf7   : > { %v450_v27 = vmul.f32 0.00390625, %v449_v26 }
  0xf9   : > { %v451_v29 = vpack.c.bf16 %v450_v27, %v450_v27 }
  0xfb   : > { %633 = vmatmul.msk.bf16.vlgmr.msra.gmra.mxu0 %vm404_vm4, %v451_v29 }
 0x178   : > { %v481_v31 = vpop.f32.mrf.mxu0 }
 0x179   : > { %v482_v32 = vadd.f32 %v481_v31, %v456_v30 }
 0x17b   : > { %485 = vst [vmem:[%s932_s14] sm:$0x1] %v482_v32 }
 0x180   : > { %v483_v33 = vpop.f32.mrf.mxu0 }
 0x181 PF: > { %s495_s29 = scalar_lea.hbm %s1037_s4, %s812_s19  ;;  %s497_s30 = sshll.u32 %s932_s14, 4  ;;  %s498_s30 = int_to_ptr.vmem [resolvable:$true] %s497_s30 }
 0x182   : > { %s499_s7 = sshll.u32 %s495_s29, 4  ;;  %s487_s8 = scalar_lea.sflag [#allocation4], %s211_s6  ;;  %s500_s7 = int_to_ptr.hbm [resolvable:$true] %s499_s7 }
 0x183   : > { %s744_s9 = sshra.s32 %s500_s7, 4  ;;  %s750_s13 = scalar_lea.hbm %s1037_s4, 2  ;;  %s745_s9 = int_to_ptr.hbm [resolvable:$true] %s744_s9 }
 0x184   : > { %s746_s10 = scalar_lea.hbm %s745_s9, 1  ;;  %p751_p5 = scmp.lt.s32.totalorder %s745_s9, %s1037_s4 }
 0x185   : > { %p747_p1 = scmp.ne.s32.totalorder %s745_s9, %s746_s10  ;;  %p752_p6 = scmp.lt.s32.totalorder %s750_s13, %s746_s10 }
 0x187   : > { %p748_p2 = pnand %p747_p1, %p902_p3  ;;  %p753_p7 = por %p752_p6, %p751_p5 }
 0x189   : > { %p749_p4 = pneg %p748_p2 }
 0x18b   : > { %p754_p8 = pnand %p753_p7, %p749_p4 }
 0x18d   : > { %757 = shalt.err (!%p754_p8)
}
 0x18e   : > { %657 = dma.vmem_to_hbm [thread:$0]  (%p902_p3), %s498_s30, 16, %s500_s7, %s487_s8  }
 0x18f PF: > { %p663_p10 = scmp.ge.s32.totalorder %s824_s22, 2  ;;  %s511_s19 = sand.u32 1, %s796_s15  }
 0x190   : > { %s512_s6 = scalar_lea.sflag [#allocation4], %s511_s19 }
 0x191   : > { %p660_p11 = pnand %p663_p10, %p912_p9 }
 0x193   : > { %p661_p12 = pneg %p660_p11 }
 0x195   : > { %791 = dma.done.wait (%p661_p12), %s512_s6, 16  }
 0x196   : > { %793 = vsyncadd (%p661_p12), %s512_s6, 4294967280  ;;  %s17_s22 = sadd.s32 1, %s824_s22   ;;  %s1040_s15 = smov %s800_s16 }
 0x197   : > { %p14_p13 = scmp.ge.s32.totalorder %s17_s22, 6   ;;  %s1041_s16 = smov %s804_s17 }
 0x198   : > { %s1042_s17 = smov %s920_s5  ;;  %s1043_s18 = smov %s816_s20 }
 0x199   : > { %s1044_s19 = smov %s820_s21  ;;  %s1045_s20 = smov %s1048_s25 }
 0x19a   : > { %s1046_s21 = smov %s1052_s26  ;;  %16 = sbr.rel (!%p14_p13) target bundleno = 5 (0x5), region = 79 }
 0x19f   :  { %517 = vsyncpa [#allocation4], 1 }
 0x1a0   :  { %519 = vsyncpa [#allocation4 + $0x1], 1 }

</bundles_post_ra>
